<compile_context>
chip_gen: v7x
topology: tpu7x:2x2x1
jax: 0.10.0
libtpu: 0.0.40
codegen_flags: <defaults>
</compile_context>

<pallas_src>
import functools
import math

import numpy as np

import jax
import jax.numpy as jnp
from jax.experimental import pallas as pl
from jax.experimental.pallas import tpu as pltpu

NEG_SLOPE = 0.2          # PyG GATConv default LeakyReLU negative slope
MASK_VAL = -1e30         # additive mask for non-edges (f32 only)
M_INIT = -1e20           # running-max floor; exp(MASK_VAL - M_INIT) == 0 exactly


# ----------------------------------------------------------------------------
# Kernel 1: linear projection + attention scores (bf16 MXU, f32 accumulation)
# ----------------------------------------------------------------------------
def proj_kernel(x_ref, w_ref, a_ref, h_ref, s_ref):
    # bf16 operands, f32 accumulation (f32 MXU matmul is a slow multi-pass emulation).
    h32 = jnp.dot(x_ref[...], w_ref[...], preferred_element_type=jnp.float32)
    h_bf = h32.astype(jnp.bfloat16)
    h_ref[...] = h_bf                                  # lane-dense [tm, heads*f_out]
    # s[:, :heads] = per-head <h, att_src>, s[:, heads:] = per-head <h, att_dst>
    s_ref[...] = jnp.dot(h_bf, a_ref[...], preferred_element_type=jnp.float32)


def gat_project(x, w, att_src, att_dst, *, heads, f_out, block_rows):
    n, f_in = x.shape
    hf = heads * f_out
    # Block-diagonal [hf, 2*heads] matrix packing att_src / att_dst of every head.
    a_mat = jnp.zeros((hf, 2 * heads), jnp.float32)
    for hd in range(heads):
        a_mat = a_mat.at[hd * f_out:(hd + 1) * f_out, hd].set(att_src[hd])
        a_mat = a_mat.at[hd * f_out:(hd + 1) * f_out, heads + hd].set(att_dst[hd])

    x_bf = x.astype(jnp.bfloat16)
    w_bf = w.astype(jnp.bfloat16)
    a_bf = a_mat.astype(jnp.bfloat16)

    bm = min(block_rows, n)
    assert n % bm == 0
    h, s = pl.pallas_call(
        proj_kernel,
        out_shape=(jax.ShapeDtypeStruct((n, hf), jnp.bfloat16),
                   jax.ShapeDtypeStruct((n, 2 * heads), jnp.float32)),
        grid=(n // bm,),
        in_specs=[
            pl.BlockSpec((bm, f_in), lambda i: (i, 0)),
            pl.BlockSpec((f_in, hf), lambda i: (0, 0)),
            pl.BlockSpec((hf, 2 * heads), lambda i: (0, 0)),
        ],
        out_specs=(
            pl.BlockSpec((bm, hf), lambda i: (i, 0)),
            pl.BlockSpec((bm, 2 * heads), lambda i: (i, 0)),
        ),
        compiler_params=pltpu.CompilerParams(
            dimension_semantics=("parallel",)),
    )(x_bf, w_bf, a_bf)
    return h, s


# ----------------------------------------------------------------------------
# Kernel 2: block-sparse masked softmax + aggregation (online softmax over the
#           per-dst-tile list of non-empty src tiles)
# ----------------------------------------------------------------------------
def gat_attn_kernel(kmap_ref, cnt_ref,            # scalar prefetch (SMEM)
                    adj_ref,                      # [tm, tk] int8
                    sdst_ref,                     # [tm, heads] f32  (dst scores)
                    ssrc_ref,                     # [heads, tk] f32  (src scores)
                    hsrc_ref,                     # [tk, heads*f_out] bf16
                    bias_ref,                     # [1, out_width] f32
                    out_ref,                      # [tm, out_width]
                    m_sc, l_sc, acc_sc,           # [tm,H], [tm,H], [tm,H*f_out] f32
                    *, heads, f_out, concat, apply_elu, apply_log_softmax):
    i = pl.program_id(0)
    s = pl.program_id(1)

    @pl.when(s == 0)
    def _init():
        m_sc[...] = jnp.full(m_sc.shape, M_INIT, jnp.float32)
        l_sc[...] = jnp.zeros(l_sc.shape, jnp.float32)
        acc_sc[...] = jnp.zeros(acc_sc.shape, jnp.float32)

    @pl.when(s < cnt_ref[i])                      # skip compute on padded steps
    def _update():
        # Additive mask shared across heads; int8 compare (no f32 convert of adj).
        neg = jnp.where(adj_ref[...] > 0, jnp.float32(0.0), jnp.float32(MASK_VAL))
        sdst = sdst_ref[...]                      # [tm, heads]
        ssrc = ssrc_ref[...]                      # [heads, tk]
        hsrc = hsrc_ref[...]                      # [tk, heads*f_out] bf16
        m_prev = m_sc[...]
        l_prev = l_sc[...]
        acc_prev = acc_sc[...]

        new_m, new_l, new_acc = [], [], []
        for h in range(heads):                    # static lane slices per head
            e = sdst[:, h:h + 1] + ssrc[h:h + 1, :]          # [tm, tk]
            e = jnp.maximum(e, NEG_SLOPE * e) + neg          # leaky_relu + mask
            mp = m_prev[:, h:h + 1]
            mn = jnp.maximum(mp, jnp.max(e, axis=-1, keepdims=True))
            scale = jnp.exp(mp - mn)
            p = jnp.exp(e - mn)                   # masked entries underflow to 0
            new_l.append(scale * l_prev[:, h:h + 1]
                         + jnp.sum(p, axis=-1, keepdims=True))
            pv = jnp.dot(p.astype(hsrc.dtype),
                         hsrc[:, h * f_out:(h + 1) * f_out],
                         preferred_element_type=jnp.float32)
            new_acc.append(scale * acc_prev[:, h * f_out:(h + 1) * f_out] + pv)
            new_m.append(mn)

        m_sc[...] = jnp.concatenate(new_m, axis=1) if heads > 1 else new_m[0]
        l_sc[...] = jnp.concatenate(new_l, axis=1) if heads > 1 else new_l[0]
        acc_sc[...] = (jnp.concatenate(new_acc, axis=1)
                       if heads > 1 else new_acc[0])

    @pl.when(s == pl.num_programs(1) - 1)
    def _finalize():
        # Exact reciprocal on the final (log_softmax) layer for tighter parity.
        inv_l = pl.reciprocal(l_sc[...], approx=not apply_log_softmax)  # [tm, heads]
        acc = acc_sc[...]
        parts = [acc[:, h * f_out:(h + 1) * f_out] * inv_l[:, h:h + 1]
                 for h in range(heads)]
        if concat:
            o = jnp.concatenate(parts, axis=1) if heads > 1 else parts[0]
        else:
            o = parts[0]
            for ph in parts[1:]:
                o = o + ph
            o = o * (1.0 / heads)
        o = o + bias_ref[...]
        if apply_elu:
            o = jnp.where(o > 0, o, jnp.exp(o) - 1.0)
        if apply_log_softmax:
            mx = jnp.max(o, axis=-1, keepdims=True)
            z = o - mx
            o = z - jnp.log(jnp.sum(jnp.exp(z), axis=-1, keepdims=True))
        out_ref[...] = o.astype(out_ref.dtype)


def gat_attention(adj, sdst, ssrc_t, hsrc, bias, kmap, counts, max_s, *,
                  heads, f_out, concat, apply_elu, apply_log_softmax, tm, tk):
    n = adj.shape[0]
    ni = n // tm
    hf = heads * f_out
    out_width = hf if concat else f_out
    out_dtype = jnp.bfloat16 if concat else jnp.float32   # concat layer feeds layer 2
    bias_r = bias.reshape(1, out_width).astype(jnp.float32)

    kernel = functools.partial(
        gat_attn_kernel, heads=heads, f_out=f_out, concat=concat,
        apply_elu=apply_elu, apply_log_softmax=apply_log_softmax)

    grid_spec = pltpu.PrefetchScalarGridSpec(
        num_scalar_prefetch=2,
        grid=(ni, max_s),
        in_specs=[
            pl.BlockSpec((tm, tk), lambda i, s, km, ct: (i, km[i, s])),     # adj int8
            pl.BlockSpec((tm, heads), lambda i, s, km, ct: (i, 0)),         # dst scores
            pl.BlockSpec((heads, tk), lambda i, s, km, ct: (0, km[i, s])),  # src scores
            pl.BlockSpec((tk, hf), lambda i, s, km, ct: (km[i, s], 0)),     # src feats bf16
            pl.BlockSpec((1, out_width), lambda i, s, km, ct: (0, 0)),      # bias
        ],
        out_specs=pl.BlockSpec((tm, out_width), lambda i, s, km, ct: (i, 0)),
        scratch_shapes=[
            pltpu.VMEM((tm, heads), jnp.float32),    # running max
            pltpu.VMEM((tm, heads), jnp.float32),    # running denom
            pltpu.VMEM((tm, hf), jnp.float32),       # lane-dense accumulator
        ],
    )
    return pl.pallas_call(
        kernel,
        out_shape=jax.ShapeDtypeStruct((n, out_width), out_dtype),
        grid_spec=grid_spec,
        compiler_params=pltpu.CompilerParams(
            dimension_semantics=("parallel", "arbitrary"),
            vmem_limit_bytes=48 * 1024 * 1024),      # <= v7x 64 MiB physical
    )(kmap, counts, adj, sdst, ssrc_t, hsrc, bias_r)


# ----------------------------------------------------------------------------
# Layer / model glue
# ----------------------------------------------------------------------------
def gat_layer(x, w, att_src, att_dst, bias, adj, kmap, counts, max_s, *,
              heads, f_out, concat, apply_elu=False, apply_log_softmax=False,
              tm=256, tk=256):
    h, s = gat_project(x, w, att_src, att_dst, heads=heads, f_out=f_out,
                       block_rows=tm)
    # Cheap O(N*heads) layout plumbing in XLA (scores only; features stay lane-dense).
    sdst = s[:, heads:]          # [N, heads]  dst scores
    ssrc_t = s[:, :heads].T      # [heads, N]  src scores, lane = node index
    return gat_attention(adj, sdst, ssrc_t, h, bias, kmap, counts, max_s,
                         heads=heads, f_out=f_out, concat=concat,
                         apply_elu=apply_elu, apply_log_softmax=apply_log_softmax,
                         tm=tm, tk=tk)


def _round_up(a, b):
    return ((a + b - 1) // b) * b


def prepare_graph(x, adj, block_m, block_k):
    """Pad node count to a tile-friendly size, force self loops, pick tile sizes."""
    n = x.shape[0]
    if n <= max(block_m, block_k):
        n_pad = max(_round_up(n, 8), 8)
        tm = tk = n_pad                       # full-extent blocks (no (8,128) issue)
    else:
        assert block_m % 8 == 0 and block_k % 128 == 0
        n_pad = _round_up(n, math.lcm(block_m, block_k))
        tm, tk = block_m, block_k
    if n_pad != n:
        x = jnp.pad(x, ((0, n_pad - n), (0, 0)))
        adj = jnp.pad(adj.astype(jnp.int8), ((0, n_pad - n), (0, n_pad - n)))
    else:
        adj = adj.astype(jnp.int8)
    # GATConv(add_self_loops=True): every node (incl. padding) attends to itself.
    # Also guarantees every dst tile has >= 1 non-empty src tile.
    adj = jnp.maximum(adj, jnp.eye(n_pad, dtype=jnp.int8))
    return x, adj, n, tm, tk


def build_tile_schedule(adj_p, tm, tk):
    """Host-side: per dst-row tile, the ordered list of non-empty src-column tiles.

    kmap[i, s] = s-th non-empty src tile for dst tile i; trailing entries repeat the
    last valid index so Pallas skips their DMA (unchanged block index). counts[i] is
    the number of valid entries; the kernel gates compute with pl.when(s < counts[i]).
    """
    adj_np = np.asarray(jax.device_get(adj_p))
    n = adj_np.shape[0]
    ni, nk = n // tm, n // tk
    occ = adj_np.reshape(ni, tm, nk, tk).any(axis=(1, 3))      # [ni, nk]
    counts = occ.sum(axis=1).astype(np.int32)
    max_s = max(int(counts.max()), 1)
    kmap = np.zeros((ni, max_s), np.int32)
    for i in range(ni):
        nz = np.flatnonzero(occ[i])
        if nz.size:
            kmap[i, :nz.size] = nz
            kmap[i, nz.size:] = nz[-1]
    return jnp.asarray(kmap), jnp.asarray(counts), max_s


def spmm_gat_forward(x, adj, params, *, head1, head2, hid_dim, out_dim,
                     block_m=256, block_k=256):
    x_p, adj_p, n, tm, tk = prepare_graph(x, adj, block_m, block_k)
    kmap, counts, max_s = build_tile_schedule(adj_p, tm, tk)

    # Layer 1: concat heads, bias + ELU fused into the attention epilogue.
    h1 = gat_layer(x_p, params["w1"], params["att_src1"], params["att_dst1"],
                   params["bias1"], adj_p, kmap, counts, max_s,
                   heads=head1, f_out=hid_dim, concat=True, apply_elu=True,
                   tm=tm, tk=tk)
    # F.dropout(..., training=False) == identity in eval mode (and in-conv
    # attention dropout likewise).
    # Layer 2: mean over heads (concat=False), bias + log_softmax fused.
    h2 = gat_layer(h1, params["w2"], params["att_src2"], params["att_dst2"],
                   params["bias2"], adj_p, kmap, counts, max_s,
                   heads=head2, f_out=out_dim, concat=False,
                   apply_log_softmax=True, tm=tm, tk=tk)
    return h2[:n]


def init_params(key, in_dim, hid_dim, out_dim, head1, head2):
    ks = jax.random.split(key, 8)
    scale = 0.1
    return {
        "w1": scale * jax.random.normal(ks[0], (in_dim, head1 * hid_dim), jnp.float32),
        "att_src1": scale * jax.random.normal(ks[1], (head1, hid_dim), jnp.float32),
        "att_dst1": scale * jax.random.normal(ks[2], (head1, hid_dim), jnp.float32),
        "bias1": jnp.zeros((1, head1 * hid_dim), jnp.float32),
        "w2": scale * jax.random.normal(ks[3], (head1 * hid_dim, head2 * out_dim), jnp.float32),
        "att_src2": scale * jax.random.normal(ks[4], (head2, out_dim), jnp.float32),
        "att_dst2": scale * jax.random.normal(ks[5], (head2, out_dim), jnp.float32),
        "bias2": jnp.zeros((1, out_dim), jnp.float32),
    }


# ----------------------------------------------------------------------------
# Pure-JAX reference (f32, dense) for correctness checking
# ----------------------------------------------------------------------------
def gat_reference(x, adj, params, *, head1, head2, hid_dim, out_dim):
    adj_mask = (adj > 0)

    def conv(xx, w, a_src, a_dst, bias, heads, f_out, concat):
        h = xx @ w
        h3 = h.reshape(-1, heads, f_out)
        ssrc = jnp.einsum("nhf,hf->nh", h3, a_src)
        sdst = jnp.einsum("nhf,hf->nh", h3, a_dst)
        e = sdst[:, None, :] + ssrc[None, :, :]          # [dst, src, heads]
        e = jnp.where(e > 0, e, NEG_SLOPE * e)
        e = jnp.where(adj_mask[:, :, None], e, -jnp.inf)
        p = jax.nn.softmax(e, axis=1)
        o = jnp.einsum("dsh,shf->dhf", p, h3)
        if concat:
            return o.reshape(-1, heads * f_out) + bias.reshape(1, -1)
        return o.mean(axis=1) + bias.reshape(1, -1)

    h1 = jax.nn.elu(conv(x, params["w1"], params["att_src1"], params["att_dst1"],
                         params["bias1"], head1, hid_dim, True))
    h2 = conv(h1, params["w2"], params["att_src2"], params["att_dst2"],
              params["bias2"], head2, out_dim, False)
    return jax.nn.log_softmax(h2, axis=1)


if __name__ == "__main__":
    # Small, module-consistent shapes; banded sparse graph so some adjacency tiles
    # are empty and the block-sparse skipping path is exercised.
    N, IN_DIM, HID_DIM, OUT_DIM = 384, 16, 8, 8
    HEAD1, HEAD2 = 4, 1
    NUM_EDGES, BAND = 1024, 16

    key = jax.random.PRNGKey(0)
    k_src, k_delta, k_x, k_params = jax.random.split(key, 4)

    x = jax.random.normal(k_x, (N, IN_DIM), jnp.float32)
    src = jax.random.randint(k_src, (NUM_EDGES,), 0, N)
    delta = jax.random.randint(k_delta, (NUM_EDGES,), -BAND, BAND + 1)
    dst = jnp.clip(src + delta, 0, N - 1)

    # Dense adjacency mask: adj[dst, src] = 1, plus self loops (GATConv default).
    adj = jnp.zeros((N, N), jnp.int8).at[dst, src].set(1)
    adj = jnp.maximum(adj, jnp.eye(N, dtype=jnp.int8))

    params = init_params(k_params, IN_DIM, HID_DIM, OUT_DIM, HEAD1, HEAD2)

    out = spmm_gat_forward(x, adj, params,
                           head1=HEAD1, head2=HEAD2,
                           hid_dim=HID_DIM, out_dim=OUT_DIM,
                           block_m=128, block_k=128)
    out = jax.block_until_ready(out)

    assert out.shape == (N, OUT_DIM)
    assert bool(jnp.all(jnp.isfinite(out)))
    # log_softmax rows must exponentiate-sum to 1.
    row_sums = jnp.sum(jnp.exp(out), axis=1)
    assert bool(jnp.all(jnp.abs(row_sums - 1.0) < 1e-3))

    ref = gat_reference(x, adj, params, head1=HEAD1, head2=HEAD2,
                        hid_dim=HID_DIM, out_dim=OUT_DIM)
    max_err = float(jnp.max(jnp.abs(out - ref)))
    assert max_err < 5e-2, f"mismatch vs pure-JAX reference: {max_err}"
    print("KERNEL_OK")
</pallas_src>

<mosaic_0001>
module attributes {stable_mosaic.version = 11 : i64} {
  func.func @proj_kernel(%arg0: i32, %arg1: memref<128x16xbf16, #tpu.memory_space<vmem>>, %arg2: memref<16x32xbf16, #tpu.memory_space<vmem>>, %arg3: memref<32x8xbf16, #tpu.memory_space<vmem>>, %arg4: memref<128x32xbf16, #tpu.memory_space<vmem>>, %arg5: memref<128x8xf32, #tpu.memory_space<vmem>>) attributes {dimension_semantics = [#tpu.dimension_semantics<parallel>], iteration_bounds = array<i64: 3>, scalar_prefetch = 0 : i64, scratch_operands = 0 : i64, tpu.core_type = #tpu.core_type<tc>, window_params = [{transform_indices = @transform_0, window_bounds = array<i64: 128, 16>}, {pipeline_mode = #tpu.pipeline_mode<synchronous>, transform_indices = @transform_1, window_bounds = array<i64: 16, 32>}, {pipeline_mode = #tpu.pipeline_mode<synchronous>, transform_indices = @transform_2, window_bounds = array<i64: 32, 8>}, {transform_indices = @transform_3, window_bounds = array<i64: 128, 32>}, {transform_indices = @transform_4, window_bounds = array<i64: 128, 8>}]} {
    %c0 = arith.constant 0 : index
    %c0_0 = arith.constant 0 : index
    %0 = vector.load %arg1[%c0, %c0_0] : memref<128x16xbf16, #tpu.memory_space<vmem>>, vector<128x16xbf16>
    %c0_1 = arith.constant 0 : index
    %c0_2 = arith.constant 0 : index
    %1 = vector.load %arg2[%c0_1, %c0_2] : memref<16x32xbf16, #tpu.memory_space<vmem>>, vector<16x32xbf16>
    %cst = arith.constant dense<0.000000e+00> : vector<128x32xf32>
    %2 = tpu.matmul %0, %1, %cst {dimension_numbers = #tpu.dot_dimension_numbers<[1], [0], [0], [1], [0, 0, 1, 1], [], []>} : vector<128x16xbf16>, vector<16x32xbf16>, vector<128x32xf32> -> vector<128x32xf32>
    %3 = arith.truncf %2 : vector<128x32xf32> to vector<128x32xbf16>
    %c0_3 = arith.constant 0 : index
    %c0_4 = arith.constant 0 : index
    %4 = vector.load %arg4[%c0_3, %c0_4] : memref<128x32xbf16, #tpu.memory_space<vmem>>, vector<128x32xbf16>
    tpu.vector_store %arg4[%c0_3, %c0_4], %3 {strides = array<i32>} : memref<128x32xbf16, #tpu.memory_space<vmem>>, vector<128x32xbf16>,
    %c0_5 = arith.constant 0 : index
    %c0_6 = arith.constant 0 : index
    %5 = vector.load %arg3[%c0_5, %c0_6] : memref<32x8xbf16, #tpu.memory_space<vmem>>, vector<32x8xbf16>
    %cst_7 = arith.constant dense<0.000000e+00> : vector<128x8xf32>
    %6 = tpu.matmul %3, %5, %cst_7 {dimension_numbers = #tpu.dot_dimension_numbers<[1], [0], [0], [1], [0, 0, 1, 1], [], []>} : vector<128x32xbf16>, vector<32x8xbf16>, vector<128x8xf32> -> vector<128x8xf32>
    %c0_8 = arith.constant 0 : index
    %c0_9 = arith.constant 0 : index
    %7 = vector.load %arg5[%c0_8, %c0_9] : memref<128x8xf32, #tpu.memory_space<vmem>>, vector<128x8xf32>
    tpu.vector_store %arg5[%c0_8, %c0_9], %6 {strides = array<i32>} : memref<128x8xf32, #tpu.memory_space<vmem>>, vector<128x8xf32>,
    return
  }
  func.func @transform_0(%arg0: i32) -> (i32, i32) {
    %c0_i32 = arith.constant 0 : i32
    %c0_i32_0 = arith.constant 0 : i32
    return %arg0, %c0_i32 : i32, i32
  }
  func.func @transform_1(%arg0: i32) -> (i32, i32) {
    %c0_i32 = arith.constant 0 : i32
    %c0_i32_0 = arith.constant 0 : i32
    %c0_i32_1 = arith.constant 0 : i32
    return %c0_i32, %c0_i32_0 : i32, i32
  }
  func.func @transform_2(%arg0: i32) -> (i32, i32) {
    %c0_i32 = arith.constant 0 : i32
    %c0_i32_0 = arith.constant 0 : i32
    %c0_i32_1 = arith.constant 0 : i32
    return %c0_i32, %c0_i32_0 : i32, i32
  }
  func.func @transform_3(%arg0: i32) -> (i32, i32) {
    %c0_i32 = arith.constant 0 : i32
    %c0_i32_0 = arith.constant 0 : i32
    return %arg0, %c0_i32 : i32, i32
  }
  func.func @transform_4(%arg0: i32) -> (i32, i32) {
    %c0_i32 = arith.constant 0 : i32
    %c0_i32_0 = arith.constant 0 : i32
    return %arg0, %c0_i32 : i32, i32
  }
}

</mosaic_0001>

<bundles_post_ra>
// kernel: tpu_custom_call.1
= control target key start
LH: loop header
LB: loop body
LE: loop exit
PB: predicated region body
PF: predicated region fallthrough
CT: control target
= control target key end

     0   :  { %s909_s15 = smov 0   ;;  %s1026_s0 = inlined_call_operand.vmem [shape: bf16[384,16], index: 0, kind: input, shape index: {}]   ;;  %s1027_s1 = inlined_call_operand.vmem [shape: bf16[16,32], index: 1, kind: input, shape index: {}]   ;;  %s1028_s2 = inlined_call_operand.vmem [shape: bf16[32,8], index: 2, kind: input, shape index: {}]   ;;  %s1029_s3 = inlined_call_operand.vmem [shape: bf16[384,32], index: 3, kind: output, shape index: {0}]   ;;  %s1030_s4 = inlined_call_operand.vmem [shape: f32[384,8], index: 4, kind: output, shape index: {1}]  }
   0x1 LB: > { %s728_s16 = sadd.s32 4294967295, %s882_s15   ;;  %p732_p0 = scmp.ge.s32.totalorder %s882_s15, 1  ;;  %s882_s15 = sphi %s909_s15, %s15_s15  }
   0x2   : > { %p166_p1 = scmp.lt.s32.totalorder %s882_s15, 4 }
   0x4   : > { %p167_p2 = pnand %p732_p0, %p166_p1 }
   0x5   : > { %v865_v0 = vld [vmem:[%s1027_s1] sm:$0xff] (!%p167_p2)   ;;  %s733_s19 = sshll.u32 (!%p167_p2), %s728_s16, 4  ;;  %vm280_vm0 = vcmask (!%p167_p2), 130048   ;;  %v875_v10 = vld [vmem:[%s1028_s2 + $0x8] sm:$0xff] (!%p167_p2)   ;;  %vm466_vm1 = vcmask (!%p167_p2), 257024   ;;  %vm499_vm2 = vcmask (!%p167_p2), 261120  }
   0x6   : > { %170 = sbr.rel (%p167_p2) target bundleno = 476 (0x1dc), region = 32  ;;  %p198_p3 = scmp.lt.s32.totalorder (!%p167_p2), %s733_s19, 47  ;;  %819 = vmatprep.subr.bf16.mxu0 (!%p167_p2), %v865_v0  ;;  %v874_v1 = vld [vmem:[%s1028_s2] sm:$0xff] (!%p167_p2)   ;;  %vm621_vm3 = vcmask (!%p167_p2), 64512  }
   0x7   : > { %820 = vmatpush3.bf16.msra.mxu0 (!%p167_p2), %v865_v0  ;;  %837 = vmatprep.subr.bf16.mxu1 (!%p167_p2), %v874_v1 }
   0x8   : > { %838 = vmatpush3.bf16.msra.mxu1 (!%p167_p2), %v874_v1 }
   0x9   : > { %839 = vmatprep.subr.bf16.mxu1 (!%p167_p2), %v875_v10 }
   0xc   : > { %840 = vmatpush3.bf16.msra.mxu1 (!%p167_p2), %v875_v10 }
   0xd   : > { %s1032_s19 = smov (!%p198_p3, %s733_s19), 47 }
   0xe   : > { %s734_s22 = sshll.u32 %s1032_s19, 2  ;;  %s738_s5 = sshll.u32 %s1032_s19, 3 }
   0xf   : > { %s201_s25 = scalar_lea.vmem %s1026_s0, %s734_s22  ;;  %s943_s30 = scalar_lea.vmem %s1029_s3, %s734_s22 }
  0x10   : > { %v866_v2 = vld [vmem:[%s201_s25] sm:$0xff]   ;;  %v867_v3 = vld [vmem:[%s201_s25 + $0x8] sm:$0xff]   ;;  %v868_v4 = vld [vmem:[%s201_s25 + $0x10] sm:$0xff]   ;;  %s989_s8 = scalar_lea.vmem %s1030_s4, %s738_s5 }
  0x11   : > { %821 = vmatprep.mubr.msk.bf16.mxu0 %vm280_vm0, %v866_v2  ;;  %v869_v5 = vld [vmem:[%s201_s25 + $0x18] sm:$0xff]   ;;  %v870_v6 = vld [vmem:[%s201_s25 + $0x20] sm:$0xff]   ;;  %v871_v7 = vld [vmem:[%s201_s25 + $0x28] sm:$0xff]  }
  0x12   : > { %822 = vmatmul.mubr.msk.bf16.vlgmr.msra.gmra.mrb[0].mxu0 %vm280_vm0, %v867_v3  ;;  %v872_v8 = vld [vmem:[%s201_s25 + $0x30] sm:$0xff]   ;;  %v873_v9 = vld [vmem:[%s201_s25 + $0x38] sm:$0xff]  }
  0x13   : > { %825 = vmatprep.mubr.msk.bf16.mxu0 %vm280_vm0, %v868_v4 }
  0x1a   : > { %826 = vmatmul.mubr.msk.bf16.gmra.mrb[4].mxu0 %vm280_vm0, %v869_v5 }
  0x1b   : > { %829 = vmatprep.mubr.msk.bf16.mxu0 %vm280_vm0, %v870_v6 }
  0x22   : > { %830 = vmatmul.mubr.msk.bf16.gmra.mrb[8].mxu0 %vm280_vm0, %v871_v7 }
  0x23   : > { %833 = vmatprep.mubr.msk.bf16.mxu0 %vm280_vm0, %v872_v8 }
  0x2a   : > { %834 = vmatmul.mubr.msk.bf16.gmra.mrb[12].mxu0 %vm280_vm0, %v873_v9 }
  0xe5   : > { %v823_v11 = vpop.f32.mrb[0].mxu0 }
  0xe6   : > { %v786_v12 = vpack.c.bf16 %v823_v11, %v823_v11  ;;  %v339_v13 = vpop.f32.mrb[1].mxu0 }
  0xe7   : > { %v784_v14 = vpack.c.bf16 %v339_v13, %v339_v13  ;;  %v824_v15 = vpop.f32.mrb[2].mxu0 }
  0xe8   : > { %469 = vst.msk [vmem:[%s943_s30 + $0x8] sm:$0xf] %vm466_vm1, %v786_v12  ;;  %v403_v16 = vpack.c.bf16 %v824_v15, %v823_v11  ;;  %v787_v17 = vpack.c.bf16 %v824_v15, %v824_v15  ;;  %v342_v18 = vpop.f32.mrb[3].mxu0 }
  0xe9   : > { %467 = vst.msk [vmem:[%s943_s30] sm:$0xf] %vm466_vm1, %v784_v14  ;;  %v785_v19 = vpack.c.bf16 %v342_v18, %v342_v18  ;;  %v402_v20 = vpack.c.bf16 %v342_v18, %v339_v13 }
  0xea   : > { %470 = vst.msk [vmem:[%s943_s30 + $0xc] sm:$0xf] %vm466_vm1, %v787_v17 }
  0xeb   : > { %468 = vst.msk [vmem:[%s943_s30 + $0x4] sm:$0xf] %vm466_vm1, %v785_v19  ;;  %841 = vmatprep.mubr.msk.bf16.mxu1 %vm499_vm2, %v402_v20 }
  0xec   : > { %842 = vmatmul.mubr.msk.bf16.vlgmr.msra.gmra.mrb[0].mxu1 %vm499_vm2, %v403_v16 }
  0xed   : > { %v827_v21 = vpop.f32.mrb[4].mxu0 }
  0xee   : > { %v790_v22 = vpack.c.bf16 %v827_v21, %v827_v21  ;;  %v355_v23 = vpop.f32.mrb[5].mxu0 }
  0xef   : > { %v788_v24 = vpack.c.bf16 %v355_v23, %v355_v23  ;;  %v828_v25 = vpop.f32.mrb[6].mxu0 }
  0xf0   : > { %473 = vst.msk [vmem:[%s943_s30 + $0x18] sm:$0xf] %vm466_vm1, %v790_v22  ;;  %v405_v26 = vpack.c.bf16 %v828_v25, %v827_v21  ;;  %v791_v27 = vpack.c.bf16 %v828_v25, %v828_v25  ;;  %v358_v28 = vpop.f32.mrb[7].mxu0 }
  0xf1   : > { %471 = vst.msk [vmem:[%s943_s30 + $0x10] sm:$0xf] %vm466_vm1, %v788_v24  ;;  %v404_v29 = vpack.c.bf16 %v358_v28, %v355_v23  ;;  %v789_v30 = vpack.c.bf16 %v358_v28, %v358_v28 }
  0xf2   : > { %474 = vst.msk [vmem:[%s943_s30 + $0x1c] sm:$0xf] %vm466_vm1, %v791_v27 }
  0xf3   : > { %472 = vst.msk [vmem:[%s943_s30 + $0x14] sm:$0xf] %vm466_vm1, %v789_v30  ;;  %845 = vmatprep.mubr.msk.bf16.mxu1 %vm499_vm2, %v404_v29 }
  0xf4   : > { %846 = vmatmul.mubr.msk.bf16.gmra.mrb[4].mxu1 %vm499_vm2, %v405_v26 }
  0xf5   : > { %v831_v31 = vpop.f32.mrb[8].mxu0 }
  0xf6   : > { %v794_v32 = vpack.c.bf16 %v831_v31, %v831_v31  ;;  %v371_v33 = vpop.f32.mrb[9].mxu0 }
  0xf7   : > { %v792_v34 = vpack.c.bf16 %v371_v33, %v371_v33  ;;  %v832_v35 = vpop.f32.mrb[10].mxu0 }
  0xf8   : > { %477 = vst.msk [vmem:[%s943_s30 + $0x28] sm:$0xf] %vm466_vm1, %v794_v32  ;;  %v407_v36 = vpack.c.bf16 %v832_v35, %v831_v31  ;;  %v795_v37 = vpack.c.bf16 %v832_v35, %v832_v35  ;;  %v374_v38 = vpop.f32.mrb[11].mxu0 }
  0xf9   : > { %475 = vst.msk [vmem:[%s943_s30 + $0x20] sm:$0xf] %vm466_vm1, %v792_v34  ;;  %v406_v39 = vpack.c.bf16 %v374_v38, %v371_v33  ;;  %v793_v40 = vpack.c.bf16 %v374_v38, %v374_v38 }
  0xfa   : > { %478 = vst.msk [vmem:[%s943_s30 + $0x2c] sm:$0xf] %vm466_vm1, %v795_v37 }
  0xfb   : > { %476 = vst.msk [vmem:[%s943_s30 + $0x24] sm:$0xf] %vm466_vm1, %v793_v40  ;;  %849 = vmatprep.mubr.msk.bf16.mxu1 %vm499_vm2, %v406_v39 }
  0xfc   : > { %850 = vmatmul.mubr.msk.bf16.gmra.mrb[8].mxu1 %vm499_vm2, %v407_v36 }
  0xfd   : > { %v835_v41 = vpop.f32.mrb[12].mxu0 }
  0xfe   : > { %v798_v42 = vpack.c.bf16 %v835_v41, %v835_v41  ;;  %v387_v43 = vpop.f32.mrb[13].mxu0 }
  0xff   : > { %v796_v44 = vpack.c.bf16 %v387_v43, %v387_v43  ;;  %v836_v45 = vpop.f32.mrb[14].mxu0 }
 0x100   : > { %481 = vst.msk [vmem:[%s943_s30 + $0x38] sm:$0xf] %vm466_vm1, %v798_v42  ;;  %v409_v46 = vpack.c.bf16 %v836_v45, %v835_v41  ;;  %v799_v47 = vpack.c.bf16 %v836_v45, %v836_v45  ;;  %v390_v48 = vpop.f32.mrb[15].mxu0 }
 0x101   : > { %479 = vst.msk [vmem:[%s943_s30 + $0x30] sm:$0xf] %vm466_vm1, %v796_v44  ;;  %v408_v49 = vpack.c.bf16 %v390_v48, %v387_v43  ;;  %v797_v50 = vpack.c.bf16 %v390_v48, %v390_v48 }
 0x102   : > { %482 = vst.msk [vmem:[%s943_s30 + $0x3c] sm:$0xf] %vm466_vm1, %v799_v47 }
 0x103   : > { %480 = vst.msk [vmem:[%s943_s30 + $0x34] sm:$0xf] %vm466_vm1, %v797_v50  ;;  %853 = vmatprep.mubr.msk.bf16.mxu1 %vm499_vm2, %v408_v49 }
 0x104   : > { %854 = vmatmul.mubr.msk.bf16.gmra.mrb[12].mxu1 %vm499_vm2, %v409_v46 }
 0x1bf   : > { %v843_v51 = vpop.f32.mrb[0].mxu1 }
 0x1c0   : > { %624 = vst.msk [vmem:[%s989_s8 + $0x10] sm:$0xff] %vm621_vm3, %v843_v51  ;;  %v558_v52 = vpop.f32.mrb[1].mxu1 }
 0x1c1   : > { %622 = vst.msk [vmem:[%s989_s8] sm:$0xff] %vm621_vm3, %v558_v52  ;;  %v844_v53 = vpop.f32.mrb[2].mxu1 }
 0x1c2   : > { %625 = vst.msk [vmem:[%s989_s8 + $0x18] sm:$0xff] %vm621_vm3, %v844_v53  ;;  %v561_v54 = vpop.f32.mrb[3].mxu1 }
 0x1c3   : > { %623 = vst.msk [vmem:[%s989_s8 + $0x8] sm:$0xff] %vm621_vm3, %v561_v54 }
 0x1c7   : > { %v847_v55 = vpop.f32.mrb[4].mxu1 }
 0x1c8   : > { %628 = vst.msk [vmem:[%s989_s8 + $0x30] sm:$0xff] %vm621_vm3, %v847_v55  ;;  %v574_v56 = vpop.f32.mrb[5].mxu1 }
 0x1c9   : > { %626 = vst.msk [vmem:[%s989_s8 + $0x20] sm:$0xff] %vm621_vm3, %v574_v56  ;;  %v848_v57 = vpop.f32.mrb[6].mxu1 }
 0x1ca   : > { %629 = vst.msk [vmem:[%s989_s8 + $0x38] sm:$0xff] %vm621_vm3, %v848_v57  ;;  %v577_v58 = vpop.f32.mrb[7].mxu1 }
 0x1cb   : > { %627 = vst.msk [vmem:[%s989_s8 + $0x28] sm:$0xff] %vm621_vm3, %v577_v58 }
 0x1cf   : > { %v851_v59 = vpop.f32.mrb[8].mxu1 }
 0x1d0   : > { %632 = vst.msk [vmem:[%s989_s8 + $0x50] sm:$0xff] %vm621_vm3, %v851_v59  ;;  %v590_v60 = vpop.f32.mrb[9].mxu1 }
 0x1d1   : > { %630 = vst.msk [vmem:[%s989_s8 + $0x40] sm:$0xff] %vm621_vm3, %v590_v60  ;;  %v852_v61 = vpop.f32.mrb[10].mxu1 }
 0x1d2   : > { %633 = vst.msk [vmem:[%s989_s8 + $0x58] sm:$0xff] %vm621_vm3, %v852_v61  ;;  %v593_v62 = vpop.f32.mrb[11].mxu1 }
 0x1d3   : > { %631 = vst.msk [vmem:[%s989_s8 + $0x48] sm:$0xff] %vm621_vm3, %v593_v62 }
 0x1d7   : > { %v855_v63 = vpop.f32.mrb[12].mxu1 }
 0x1d8   : > { %636 = vst.msk [vmem:[%s989_s8 + $0x70] sm:$0xff] %vm621_vm3, %v855_v63  ;;  %v606_v0 = vpop.f32.mrb[13].mxu1 }
 0x1d9   : > { %634 = vst.msk [vmem:[%s989_s8 + $0x60] sm:$0xff] %vm621_vm3, %v606_v0  ;;  %v856_v1 = vpop.f32.mrb[14].mxu1 }
 0x1da   : > { %637 = vst.msk [vmem:[%s989_s8 + $0x78] sm:$0xff] %vm621_vm3, %v856_v1  ;;  %v609_v2 = vpop.f32.mrb[15].mxu1 }
 0x1db   : > { %635 = vst.msk [vmem:[%s989_s8 + $0x68] sm:$0xff] %vm621_vm3, %v609_v2 }
 0x1dc PF: > { %s15_s15 = sadd.s32 1, %s882_s15  }
 0x1dd   : > { %p12_p4 = scmp.ge.s32.totalorder %s15_s15, 5  }
 0x1df   :  { %14 = sbr.rel (!%p12_p4) target bundleno = 1 (0x1), region = 74 }

</bundles_post_ra>
